<compile_context>
chip_gen: v7x
topology: tpu7x:2x2x1
jax: 0.10.0
libtpu: 0.0.40
codegen_flags: <defaults>
</compile_context>

<pallas_src>
import jax
import jax.numpy as jnp
from jax.experimental import pallas as pl
from jax.experimental.pallas import tpu as pltpu  # noqa: F401  (TPU backend)

_EPS = 1e-5


# ------------------------------ kernel helpers -------------------------------

def _shift_lanes(x, off):
    """y[:, l] = x[:, (l + off) % M]. Wrapped lanes must be masked by caller."""
    m = x.shape[-1]
    off = off % m
    if off == 0:
        return x
    return jnp.concatenate([x[:, off:], x[:, :off]], axis=-1)


def _build_fused_kernel(n_layers, tap_offsets, has_downsample, m_total, eps=_EPS):
    """Builds the fused residual-block kernel.

    Ref order: p1T, (w0,g0,b0), (w_i,g_i,b_i) for i=1..n_layers-1,
               mask_i for i=1..n_layers-1,
               (pdT, wd, gd, bd) if has_downsample else (idT,),
               out_ref.
    All activations/weights use the transposed lane-dense layout [C, M].
    """
    n_later = n_layers - 1
    inv_m = 1.0 / float(m_total)

    def _bn(acc, g, b):
        # train-mode BatchNorm over the M lanes (== over (N,H,W)), single pass,
        # folded into one per-channel scale/shift.
        mean = jnp.sum(acc, axis=1, keepdims=True) * inv_m            # [C,1]
        msq = jnp.sum(acc * acc, axis=1, keepdims=True) * inv_m       # [C,1]
        var = msq - mean * mean
        scale = g * jax.lax.rsqrt(var + eps)                          # [C,1]
        shift = b - mean * scale                                      # [C,1]
        return acc * scale + shift

    def kernel(*refs):
        idx = 0
        p1T_ref = refs[idx]; idx += 1
        w0_ref, g0_ref, b0_ref = refs[idx:idx + 3]; idx += 3
        later = []
        for _ in range(n_later):
            later.append(tuple(refs[idx:idx + 3])); idx += 3
        mask_refs = list(refs[idx:idx + n_later]); idx += n_later
        if has_downsample:
            pdT_ref, wd_ref, gd_ref, bd_ref = refs[idx:idx + 4]; idx += 4
        else:
            idT_ref = refs[idx]; idx += 1
        out_ref = refs[idx]

        # ---- layer 0: conv (as MXU matmul, K padded to 128) + BN + ReLU ----
        h = jnp.dot(w0_ref[...], p1T_ref[...], preferred_element_type=jnp.float32)
        h = jnp.maximum(_bn(h, g0_ref[...], b0_ref[...]), 0.0)

        # ---- later layers: im2col built in-register via lane shifts ----
        for li in range(n_later):
            w_ref, g_ref, b_ref = later[li]
            parts = []
            for t, off in enumerate(tap_offsets[li]):
                parts.append(_shift_lanes(h, off) * mask_refs[li][t:t + 1, :])
            lhs = parts[0] if len(parts) == 1 else jnp.concatenate(parts, axis=0)
            acc = jnp.dot(w_ref[...], lhs, preferred_element_type=jnp.float32)
            h = jnp.maximum(_bn(acc, g_ref[...], b_ref[...]), 0.0)

        # ---- identity / downsample path (1x1 conv + BN, no ReLU) ----
        if has_downsample:
            accd = jnp.dot(pdT_ref[...].T if False else wd_ref[...],
                           pdT_ref[...], preferred_element_type=jnp.float32)
            identity = _bn(accd, gd_ref[...], bd_ref[...])
        else:
            identity = idT_ref[...]

        # residual add + final ReLU (h already has the last layer's ReLU).
        out_ref[...] = jnp.maximum(h + identity, 0.0)

    return kernel


# ------------------------------ JAX glue -------------------------------------

def _im2col_T(x_nhwc, kh, kw, stride, padding):
    """(N,H,W,C) -> patches^T [kh*kw*C, N*Ho*Wo], feature order (dy,dx,c)."""
    N, H, W, C = x_nhwc.shape
    xp = jnp.pad(x_nhwc, ((0, 0), (padding, padding), (padding, padding), (0, 0)))
    Ho = (H + 2 * padding - kh) // stride + 1
    Wo = (W + 2 * padding - kw) // stride + 1
    cols = []
    for dy in range(kh):
        for dx in range(kw):
            cols.append(xp[:, dy:dy + stride * Ho:stride,
                           dx:dx + stride * Wo:stride, :])
    patches = jnp.concatenate(cols, axis=-1)            # (N,Ho,Wo,kh*kw*C)
    return patches.reshape(N * Ho * Wo, kh * kw * C).T, (N, Ho, Wo)


def _w_matrix_T(w_oihw):
    """(O,I,kh,kw) -> [O, kh*kw*I] matching the (dy,dx,c) feature order."""
    O, I, kh, kw = w_oihw.shape
    return jnp.transpose(w_oihw, (0, 2, 3, 1)).reshape(O, kh * kw * I).astype(jnp.float32)


def _pad_k(pT, wm, mult=128):
    """Zero-pad the contraction dim (rows of pT / cols of wm) to a multiple of mult."""
    K = pT.shape[0]
    Kp = -(-K // mult) * mult
    if Kp != K:
        pT = jnp.pad(pT, ((0, Kp - K), (0, 0)))
        wm = jnp.pad(wm, ((0, 0), (0, Kp - K)))
    return pT, wm


def _col(v):
    return v.reshape(-1, 1).astype(jnp.float32)


def residual_block_forward(x_nchw, layer_params, down_params):
    """layer_params: list of (w, gamma, beta, ks, stride, padding).
    down_params: None or (w, gamma, beta, stride)."""
    x = jnp.transpose(x_nchw, (0, 2, 3, 1)).astype(jnp.float32)        # NHWC
    N, H, W, Cin0 = x.shape

    # layer 0: im2col in the wrapper (its input already lives in HBM).
    w0, g0, b0, ks0, s0, p0 = layer_params[0]
    if ks0 == 1:
        p0 = 0
    p1T, (_, Ho, Wo) = _im2col_T(x, ks0, ks0, s0, p0)
    M = N * Ho * Wo
    w0m = _w_matrix_T(w0)
    p1T, w0m = _pad_k(p1T, w0m)
    layer_inputs = [p1T, w0m, _col(g0), _col(b0)]

    # later layers: stride-1 'same' convs executed fully in-kernel.
    lane = jnp.arange(M)
    ho_idx = (lane % (Ho * Wo)) // Wo
    wo_idx = lane % Wo
    tap_offsets, mask_arrays = [], []
    for (w, g, b, ks, st, pd) in layer_params[1:]:
        if ks == 1:
            pd = 0
        # TODO(synk): later layers with stride != 1 (or non-'same' padding)
        # change the spatial grid mid-kernel; not supported by this fused kernel.
        assert st == 1 and 2 * pd == ks - 1, \
            "fused kernel supports only stride-1 'same' convs after the first layer"
        offs, masks = [], []
        for dy in range(ks):
            for dx in range(ks):
                offs.append((dy - pd) * Wo + (dx - pd))
                valid = ((ho_idx + dy - pd >= 0) & (ho_idx + dy - pd < Ho) &
                         (wo_idx + dx - pd >= 0) & (wo_idx + dx - pd < Wo))
                masks.append(valid.astype(jnp.float32))
        tap_offsets.append(offs)
        mask_arrays.append(jnp.stack(masks, axis=0))                   # [ks*ks, M]
        layer_inputs += [_w_matrix_T(w), _col(g), _col(b)]

    # identity / downsample path.
    c_last = layer_params[-1][0].shape[0]
    if down_params is not None:
        wd, gd, bd, sd = down_params
        xd = x[:, ::sd, ::sd, :]
        assert xd.shape[1] == Ho and xd.shape[2] == Wo
        pdT = xd.reshape(N * Ho * Wo, Cin0).T
        wdm = _w_matrix_T(wd)
        pdT, wdm = _pad_k(pdT, wdm)
        ds_inputs = [pdT, wdm, _col(gd), _col(bd)]
    else:
        assert Cin0 == c_last and (H, W) == (Ho, Wo)
        ds_inputs = [x.reshape(M, Cin0).T]

    kernel = _build_fused_kernel(
        n_layers=len(layer_params),
        tap_offsets=tap_offsets,
        has_downsample=down_params is not None,
        m_total=M,
    )
    # single invocation, everything resident in VMEM; output is [C, M] so the
    # last (lane) dim is a full multiple of 128.
    out = pl.pallas_call(
        kernel,
        out_shape=jax.ShapeDtypeStruct((c_last, M), jnp.float32),
    )(*(layer_inputs + mask_arrays + ds_inputs))

    # [C, N*Ho*Wo] -> NCHW
    return out.reshape(c_last, N, Ho, Wo).transpose(1, 0, 2, 3)


# ------------------------------ reference ------------------------------------

def _ref_forward(x_nchw, layer_params, down_params):
    def conv(x, w, stride, padding):
        return jax.lax.conv_general_dilated(
            x, w, window_strides=(stride, stride),
            padding=[(padding, padding), (padding, padding)],
            dimension_numbers=('NCHW', 'OIHW', 'NCHW'))

    def bn_train(x, g, b):
        mean = jnp.mean(x, axis=(0, 2, 3), keepdims=True)
        var = jnp.mean((x - mean) ** 2, axis=(0, 2, 3), keepdims=True)
        return (x - mean) * jax.lax.rsqrt(var + _EPS) * g.reshape(1, -1, 1, 1) \
            + b.reshape(1, -1, 1, 1)

    identity = x_nchw
    cur = x_nchw
    for (w, g, b, ks, stride, padding) in layer_params:
        if ks == 1:
            padding = 0
        cur = jnp.maximum(bn_train(conv(cur, w, stride, padding), g, b), 0.0)
    if down_params is not None:
        w, g, b, stride = down_params
        identity = bn_train(conv(identity, w, stride, 0), g, b)
    return jnp.maximum(cur + identity, 0.0)


# ------------------------------ main ------------------------------------------

if __name__ == "__main__":
    key = jax.random.PRNGKey(0)
    keys = iter(jax.random.split(key, 32))

    # ResidualBlock(blocks=[[8,3,2,1],[8,3,1,1]], in_features_list=[4,8])
    blocks = [[8, 3, 2, 1], [8, 3, 1, 1]]
    in_features_list = [4, 8]

    layer_params = []
    for (out_f, ks, stride, padding), in_f in zip(blocks, in_features_list):
        w = jax.random.normal(next(keys), (out_f, in_f, ks, ks), jnp.float32) * 0.1
        g = jax.random.uniform(next(keys), (out_f,), jnp.float32, 0.5, 1.5)
        b = jax.random.normal(next(keys), (out_f,), jnp.float32) * 0.1
        layer_params.append((w, g, b, ks, stride, padding))

    # downsample exists iff stride != 1 or in_features != out_features
    stride0 = blocks[0][2]
    in0 = in_features_list[0]
    out_last = blocks[-1][0]
    if stride0 != 1 or in0 != out_last:
        w = jax.random.normal(next(keys), (out_last, in0, 1, 1), jnp.float32) * 0.1
        g = jax.random.uniform(next(keys), (out_last,), jnp.float32, 0.5, 1.5)
        b = jax.random.normal(next(keys), (out_last,), jnp.float32) * 0.1
        down_params = (w, g, b, stride0)
    else:
        down_params = None

    x = jax.random.normal(next(keys), (2, 4, 16, 16), jnp.float32)

    fwd = jax.jit(lambda xx: residual_block_forward(xx, layer_params, down_params))
    out = jax.block_until_ready(fwd(x))

    ref = _ref_forward(x, layer_params, down_params)
    assert out.shape == ref.shape, (out.shape, ref.shape)
    max_err = float(jnp.max(jnp.abs(out - ref)))
    assert jnp.allclose(out, ref, atol=2e-4, rtol=2e-4), max_err
    print("KERNEL_OK")
</pallas_src>

<mosaic_0001>
module attributes {stable_mosaic.version = 11 : i64} {
  func.func @kernel(%arg0: memref<128x128xf32, #tpu.memory_space<vmem>>, %arg1: memref<8x128xf32, #tpu.memory_space<vmem>>, %arg2: memref<8x1xf32, #tpu.memory_space<vmem>>, %arg3: memref<8x1xf32, #tpu.memory_space<vmem>>, %arg4: memref<8x72xf32, #tpu.memory_space<vmem>>, %arg5: memref<8x1xf32, #tpu.memory_space<vmem>>, %arg6: memref<8x1xf32, #tpu.memory_space<vmem>>, %arg7: memref<9x128xf32, #tpu.memory_space<vmem>>, %arg8: memref<128x128xf32, #tpu.memory_space<vmem>>, %arg9: memref<8x128xf32, #tpu.memory_space<vmem>>, %arg10: memref<8x1xf32, #tpu.memory_space<vmem>>, %arg11: memref<8x1xf32, #tpu.memory_space<vmem>>, %arg12: memref<8x128xf32, #tpu.memory_space<vmem>>) attributes {dimension_semantics = [], scalar_prefetch = 0 : i64, scratch_operands = 0 : i64, tpu.core_type = #tpu.core_type<tc>} {
    %c0 = arith.constant 0 : index
    %c0_0 = arith.constant 0 : index
    %0 = vector.load %arg1[%c0, %c0_0] : memref<8x128xf32, #tpu.memory_space<vmem>>, vector<8x128xf32>
    %c0_1 = arith.constant 0 : index
    %c0_2 = arith.constant 0 : index
    %1 = vector.load %arg0[%c0_1, %c0_2] : memref<128x128xf32, #tpu.memory_space<vmem>>, vector<128x128xf32>
    %cst = arith.constant dense<0.000000e+00> : vector<8x128xf32>
    %2 = tpu.matmul %0, %1, %cst {dimension_numbers = #tpu.dot_dimension_numbers<[1], [0], [0], [1], [0, 0, 1, 1], [], []>} : vector<8x128xf32>, vector<128x128xf32>, vector<8x128xf32> -> vector<8x128xf32>
    %c0_3 = arith.constant 0 : index
    %c0_4 = arith.constant 0 : index
    %3 = vector.load %arg2[%c0_3, %c0_4] : memref<8x1xf32, #tpu.memory_space<vmem>>, vector<8x1xf32>
    %c0_5 = arith.constant 0 : index
    %c0_6 = arith.constant 0 : index
    %4 = vector.load %arg3[%c0_5, %c0_6] : memref<8x1xf32, #tpu.memory_space<vmem>>, vector<8x1xf32>
    %cst_7 = arith.constant dense<0.000000e+00> : vector<8xf32>
    %5 = vector.multi_reduction <add>, %2, %cst_7 [1] : vector<8x128xf32> to vector<8xf32>
    %6 = vector.shape_cast %5 : vector<8xf32> to vector<8x1xf32>
    %cst_8 = arith.constant 7.812500e-03 : f32
    %7 = vector.broadcast %cst_8 : f32 to vector<8x1xf32>
    %8 = arith.mulf %6, %7 : vector<8x1xf32>
    %9 = arith.mulf %2, %2 : vector<8x128xf32>
    %cst_9 = arith.constant dense<0.000000e+00> : vector<8xf32>
    %10 = vector.multi_reduction <add>, %9, %cst_9 [1] : vector<8x128xf32> to vector<8xf32>
    %11 = vector.shape_cast %10 : vector<8xf32> to vector<8x1xf32>
    %cst_10 = arith.constant 7.812500e-03 : f32
    %12 = vector.broadcast %cst_10 : f32 to vector<8x1xf32>
    %13 = arith.mulf %11, %12 : vector<8x1xf32>
    %14 = arith.mulf %8, %8 : vector<8x1xf32>
    %15 = arith.subf %13, %14 : vector<8x1xf32>
    %cst_11 = arith.constant 9.99999974E-6 : f32
    %16 = vector.broadcast %cst_11 : f32 to vector<8x1xf32>
    %17 = arith.addf %15, %16 : vector<8x1xf32>
    %18 = math.rsqrt %17 : vector<8x1xf32>
    %19 = arith.mulf %3, %18 : vector<8x1xf32>
    %20 = arith.mulf %8, %19 : vector<8x1xf32>
    %21 = arith.subf %4, %20 : vector<8x1xf32>
    %22 = vector.broadcast %19 : vector<8x1xf32> to vector<8x128xf32>
    %23 = arith.mulf %2, %22 : vector<8x128xf32>
    %24 = vector.broadcast %21 : vector<8x1xf32> to vector<8x128xf32>
    %25 = arith.addf %23, %24 : vector<8x128xf32>
    %cst_12 = arith.constant 0.000000e+00 : f32
    %26 = vector.broadcast %cst_12 : f32 to vector<8x128xf32>
    %27 = arith.maximumf %25, %26 : vector<8x128xf32>
    %28 = vector.extract_strided_slice %27 {offsets = [0, 119], sizes = [8, 9], strides = [1, 1]} : vector<8x128xf32> to vector<8x9xf32>
    %29 = vector.extract_strided_slice %27 {offsets = [0, 0], sizes = [8, 119], strides = [1, 1]} : vector<8x128xf32> to vector<8x119xf32>
    %30 = tpu.concatenate %28, %29 in 1 : vector<8x9xf32>, vector<8x119xf32> -> vector<8x128xf32>
    %c0_13 = arith.constant 0 : index
    %c0_14 = arith.constant 0 : index
    %31 = vector.load %arg7[%c0_13, %c0_14] : memref<9x128xf32, #tpu.memory_space<vmem>>, vector<1x128xf32>
    %32 = vector.broadcast %31 : vector<1x128xf32> to vector<8x128xf32>
    %33 = arith.mulf %30, %32 : vector<8x128xf32>
    %34 = vector.extract_strided_slice %27 {offsets = [0, 120], sizes = [8, 8], strides = [1, 1]} : vector<8x128xf32> to vector<8x8xf32>
    %35 = vector.extract_strided_slice %27 {offsets = [0, 0], sizes = [8, 120], strides = [1, 1]} : vector<8x128xf32> to vector<8x120xf32>
    %36 = tpu.concatenate %34, %35 in 1 : vector<8x8xf32>, vector<8x120xf32> -> vector<8x128xf32>
    %c1 = arith.constant 1 : index
    %c0_15 = arith.constant 0 : index
    %37 = vector.load %arg7[%c1, %c0_15] : memref<9x128xf32, #tpu.memory_space<vmem>>, vector<1x128xf32>
    %38 = vector.broadcast %37 : vector<1x128xf32> to vector<8x128xf32>
    %39 = arith.mulf %36, %38 : vector<8x128xf32>
    %40 = vector.extract_strided_slice %27 {offsets = [0, 121], sizes = [8, 7], strides = [1, 1]} : vector<8x128xf32> to vector<8x7xf32>
    %41 = vector.extract_strided_slice %27 {offsets = [0, 0], sizes = [8, 121], strides = [1, 1]} : vector<8x128xf32> to vector<8x121xf32>
    %42 = tpu.concatenate %40, %41 in 1 : vector<8x7xf32>, vector<8x121xf32> -> vector<8x128xf32>
    %c2 = arith.constant 2 : index
    %c0_16 = arith.constant 0 : index
    %43 = vector.load %arg7[%c2, %c0_16] : memref<9x128xf32, #tpu.memory_space<vmem>>, vector<1x128xf32>
    %44 = vector.broadcast %43 : vector<1x128xf32> to vector<8x128xf32>
    %45 = arith.mulf %42, %44 : vector<8x128xf32>
    %46 = vector.extract_strided_slice %27 {offsets = [0, 127], sizes = [8, 1], strides = [1, 1]} : vector<8x128xf32> to vector<8x1xf32>
    %47 = vector.extract_strided_slice %27 {offsets = [0, 0], sizes = [8, 127], strides = [1, 1]} : vector<8x128xf32> to vector<8x127xf32>
    %48 = tpu.concatenate %46, %47 in 1 : vector<8x1xf32>, vector<8x127xf32> -> vector<8x128xf32>
    %c3 = arith.constant 3 : index
    %c0_17 = arith.constant 0 : index
    %49 = vector.load %arg7[%c3, %c0_17] : memref<9x128xf32, #tpu.memory_space<vmem>>, vector<1x128xf32>
    %50 = vector.broadcast %49 : vector<1x128xf32> to vector<8x128xf32>
    %51 = arith.mulf %48, %50 : vector<8x128xf32>
    %c4 = arith.constant 4 : index
    %c0_18 = arith.constant 0 : index
    %52 = vector.load %arg7[%c4, %c0_18] : memref<9x128xf32, #tpu.memory_space<vmem>>, vector<1x128xf32>
    %53 = vector.broadcast %52 : vector<1x128xf32> to vector<8x128xf32>
    %54 = arith.mulf %27, %53 : vector<8x128xf32>
    %55 = vector.extract_strided_slice %27 {offsets = [0, 1], sizes = [8, 127], strides = [1, 1]} : vector<8x128xf32> to vector<8x127xf32>
    %56 = vector.extract_strided_slice %27 {offsets = [0, 0], sizes = [8, 1], strides = [1, 1]} : vector<8x128xf32> to vector<8x1xf32>
    %57 = tpu.concatenate %55, %56 in 1 : vector<8x127xf32>, vector<8x1xf32> -> vector<8x128xf32>
    %c5 = arith.constant 5 : index
    %c0_19 = arith.constant 0 : index
    %58 = vector.load %arg7[%c5, %c0_19] : memref<9x128xf32, #tpu.memory_space<vmem>>, vector<1x128xf32>
    %59 = vector.broadcast %58 : vector<1x128xf32> to vector<8x128xf32>
    %60 = arith.mulf %57, %59 : vector<8x128xf32>
    %61 = vector.extract_strided_slice %27 {offsets = [0, 7], sizes = [8, 121], strides = [1, 1]} : vector<8x128xf32> to vector<8x121xf32>
    %62 = vector.extract_strided_slice %27 {offsets = [0, 0], sizes = [8, 7], strides = [1, 1]} : vector<8x128xf32> to vector<8x7xf32>
    %63 = tpu.concatenate %61, %62 in 1 : vector<8x121xf32>, vector<8x7xf32> -> vector<8x128xf32>
    %c6 = arith.constant 6 : index
    %c0_20 = arith.constant 0 : index
    %64 = vector.load %arg7[%c6, %c0_20] : memref<9x128xf32, #tpu.memory_space<vmem>>, vector<1x128xf32>
    %65 = vector.broadcast %64 : vector<1x128xf32> to vector<8x128xf32>
    %66 = arith.mulf %63, %65 : vector<8x128xf32>
    %67 = vector.extract_strided_slice %27 {offsets = [0, 8], sizes = [8, 120], strides = [1, 1]} : vector<8x128xf32> to vector<8x120xf32>
    %68 = vector.extract_strided_slice %27 {offsets = [0, 0], sizes = [8, 8], strides = [1, 1]} : vector<8x128xf32> to vector<8x8xf32>
    %69 = tpu.concatenate %67, %68 in 1 : vector<8x120xf32>, vector<8x8xf32> -> vector<8x128xf32>
    %c7 = arith.constant 7 : index
    %c0_21 = arith.constant 0 : index
    %70 = vector.load %arg7[%c7, %c0_21] : memref<9x128xf32, #tpu.memory_space<vmem>>, vector<1x128xf32>
    %71 = vector.broadcast %70 : vector<1x128xf32> to vector<8x128xf32>
    %72 = arith.mulf %69, %71 : vector<8x128xf32>
    %73 = vector.extract_strided_slice %27 {offsets = [0, 9], sizes = [8, 119], strides = [1, 1]} : vector<8x128xf32> to vector<8x119xf32>
    %74 = vector.extract_strided_slice %27 {offsets = [0, 0], sizes = [8, 9], strides = [1, 1]} : vector<8x128xf32> to vector<8x9xf32>
    %75 = tpu.concatenate %73, %74 in 1 : vector<8x119xf32>, vector<8x9xf32> -> vector<8x128xf32>
    %c8 = arith.constant 8 : index
    %c0_22 = arith.constant 0 : index
    %76 = vector.load %arg7[%c8, %c0_22] : memref<9x128xf32, #tpu.memory_space<vmem>>, vector<1x128xf32>
    %77 = vector.broadcast %76 : vector<1x128xf32> to vector<8x128xf32>
    %78 = arith.mulf %75, %77 : vector<8x128xf32>
    %79 = tpu.concatenate %33, %39, %45, %51, %54, %60, %66, %72, %78 in 0 : vector<8x128xf32>, vector<8x128xf32>, vector<8x128xf32>, vector<8x128xf32>, vector<8x128xf32>, vector<8x128xf32>, vector<8x128xf32>, vector<8x128xf32>, vector<8x128xf32> -> vector<72x128xf32>
    %c0_23 = arith.constant 0 : index
    %c0_24 = arith.constant 0 : index
    %80 = vector.load %arg4[%c0_23, %c0_24] : memref<8x72xf32, #tpu.memory_space<vmem>>, vector<8x72xf32>
    %cst_25 = arith.constant dense<0.000000e+00> : vector<8x128xf32>
    %81 = tpu.matmul %80, %79, %cst_25 {dimension_numbers = #tpu.dot_dimension_numbers<[1], [0], [0], [1], [0, 0, 1, 1], [], []>} : vector<8x72xf32>, vector<72x128xf32>, vector<8x128xf32> -> vector<8x128xf32>
    %c0_26 = arith.constant 0 : index
    %c0_27 = arith.constant 0 : index
    %82 = vector.load %arg5[%c0_26, %c0_27] : memref<8x1xf32, #tpu.memory_space<vmem>>, vector<8x1xf32>
    %c0_28 = arith.constant 0 : index
    %c0_29 = arith.constant 0 : index
    %83 = vector.load %arg6[%c0_28, %c0_29] : memref<8x1xf32, #tpu.memory_space<vmem>>, vector<8x1xf32>
    %cst_30 = arith.constant dense<0.000000e+00> : vector<8xf32>
    %84 = vector.multi_reduction <add>, %81, %cst_30 [1] : vector<8x128xf32> to vector<8xf32>
    %85 = vector.shape_cast %84 : vector<8xf32> to vector<8x1xf32>
    %cst_31 = arith.constant 7.812500e-03 : f32
    %86 = vector.broadcast %cst_31 : f32 to vector<8x1xf32>
    %87 = arith.mulf %85, %86 : vector<8x1xf32>
    %88 = arith.mulf %81, %81 : vector<8x128xf32>
    %cst_32 = arith.constant dense<0.000000e+00> : vector<8xf32>
    %89 = vector.multi_reduction <add>, %88, %cst_32 [1] : vector<8x128xf32> to vector<8xf32>
    %90 = vector.shape_cast %89 : vector<8xf32> to vector<8x1xf32>
    %cst_33 = arith.constant 7.812500e-03 : f32
    %91 = vector.broadcast %cst_33 : f32 to vector<8x1xf32>
    %92 = arith.mulf %90, %91 : vector<8x1xf32>
    %93 = arith.mulf %87, %87 : vector<8x1xf32>
    %94 = arith.subf %92, %93 : vector<8x1xf32>
    %cst_34 = arith.constant 9.99999974E-6 : f32
    %95 = vector.broadcast %cst_34 : f32 to vector<8x1xf32>
    %96 = arith.addf %94, %95 : vector<8x1xf32>
    %97 = math.rsqrt %96 : vector<8x1xf32>
    %98 = arith.mulf %82, %97 : vector<8x1xf32>
    %99 = arith.mulf %87, %98 : vector<8x1xf32>
    %100 = arith.subf %83, %99 : vector<8x1xf32>
    %101 = vector.broadcast %98 : vector<8x1xf32> to vector<8x128xf32>
    %102 = arith.mulf %81, %101 : vector<8x128xf32>
    %103 = vector.broadcast %100 : vector<8x1xf32> to vector<8x128xf32>
    %104 = arith.addf %102, %103 : vector<8x128xf32>
    %cst_35 = arith.constant 0.000000e+00 : f32
    %105 = vector.broadcast %cst_35 : f32 to vector<8x128xf32>
    %106 = arith.maximumf %104, %105 : vector<8x128xf32>
    %c0_36 = arith.constant 0 : index
    %c0_37 = arith.constant 0 : index
    %107 = vector.load %arg9[%c0_36, %c0_37] : memref<8x128xf32, #tpu.memory_space<vmem>>, vector<8x128xf32>
    %c0_38 = arith.constant 0 : index
    %c0_39 = arith.constant 0 : index
    %108 = vector.load %arg8[%c0_38, %c0_39] : memref<128x128xf32, #tpu.memory_space<vmem>>, vector<128x128xf32>
    %cst_40 = arith.constant dense<0.000000e+00> : vector<8x128xf32>
    %109 = tpu.matmul %107, %108, %cst_40 {dimension_numbers = #tpu.dot_dimension_numbers<[1], [0], [0], [1], [0, 0, 1, 1], [], []>} : vector<8x128xf32>, vector<128x128xf32>, vector<8x128xf32> -> vector<8x128xf32>
    %c0_41 = arith.constant 0 : index
    %c0_42 = arith.constant 0 : index
    %110 = vector.load %arg10[%c0_41, %c0_42] : memref<8x1xf32, #tpu.memory_space<vmem>>, vector<8x1xf32>
    %c0_43 = arith.constant 0 : index
    %c0_44 = arith.constant 0 : index
    %111 = vector.load %arg11[%c0_43, %c0_44] : memref<8x1xf32, #tpu.memory_space<vmem>>, vector<8x1xf32>
    %cst_45 = arith.constant dense<0.000000e+00> : vector<8xf32>
    %112 = vector.multi_reduction <add>, %109, %cst_45 [1] : vector<8x128xf32> to vector<8xf32>
    %113 = vector.shape_cast %112 : vector<8xf32> to vector<8x1xf32>
    %cst_46 = arith.constant 7.812500e-03 : f32
    %114 = vector.broadcast %cst_46 : f32 to vector<8x1xf32>
    %115 = arith.mulf %113, %114 : vector<8x1xf32>
    %116 = arith.mulf %109, %109 : vector<8x128xf32>
    %cst_47 = arith.constant dense<0.000000e+00> : vector<8xf32>
    %117 = vector.multi_reduction <add>, %116, %cst_47 [1] : vector<8x128xf32> to vector<8xf32>
    %118 = vector.shape_cast %117 : vector<8xf32> to vector<8x1xf32>
    %cst_48 = arith.constant 7.812500e-03 : f32
    %119 = vector.broadcast %cst_48 : f32 to vector<8x1xf32>
    %120 = arith.mulf %118, %119 : vector<8x1xf32>
    %121 = arith.mulf %115, %115 : vector<8x1xf32>
    %122 = arith.subf %120, %121 : vector<8x1xf32>
    %cst_49 = arith.constant 9.99999974E-6 : f32
    %123 = vector.broadcast %cst_49 : f32 to vector<8x1xf32>
    %124 = arith.addf %122, %123 : vector<8x1xf32>
    %125 = math.rsqrt %124 : vector<8x1xf32>
    %126 = arith.mulf %110, %125 : vector<8x1xf32>
    %127 = arith.mulf %115, %126 : vector<8x1xf32>
    %128 = arith.subf %111, %127 : vector<8x1xf32>
    %129 = vector.broadcast %126 : vector<8x1xf32> to vector<8x128xf32>
    %130 = arith.mulf %109, %129 : vector<8x128xf32>
    %131 = vector.broadcast %128 : vector<8x1xf32> to vector<8x128xf32>
    %132 = arith.addf %130, %131 : vector<8x128xf32>
    %133 = arith.addf %106, %132 : vector<8x128xf32>
    %cst_50 = arith.constant 0.000000e+00 : f32
    %134 = vector.broadcast %cst_50 : f32 to vector<8x128xf32>
    %135 = arith.maximumf %133, %134 : vector<8x128xf32>
    %c0_51 = arith.constant 0 : index
    %c0_52 = arith.constant 0 : index
    %136 = vector.load %arg12[%c0_51, %c0_52] : memref<8x128xf32, #tpu.memory_space<vmem>>, vector<8x128xf32>
    tpu.vector_store %arg12[%c0_51, %c0_52], %135 {strides = array<i32>} : memref<8x128xf32, #tpu.memory_space<vmem>>, vector<8x128xf32>,
    return
  }
}

</mosaic_0001>

<bundles_post_ra>
// kernel: _lambda_.1
= control target key start
LH: loop header
LB: loop body
LE: loop exit
PB: predicated region body
PF: predicated region fallthrough
CT: control target
= control target key end

     0   :  { %v687_v0 = vmov 0.0|0.0   ;;  %vm688_vm0 = vmmov 0   ;;  %v689_v4 = vmov 0.0   ;;  %v690_v30 = vmov 0   ;;  %s691_s21 = smov 8   ;;  %s692_s22 = smov 9   ;;  %s944_s0 = inlined_call_operand.vmem [shape: f32[128,128], index: 0, kind: input, shape index: {}]   ;;  %s945_s1 = inlined_call_operand.vmem [shape: f32[8,128], index: 1, kind: input, shape index: {}]   ;;  %s946_s2 = inlined_call_operand.vmem [shape: f32[8,1], index: 2, kind: input, shape index: {}]   ;;  %s947_s3 = inlined_call_operand.vmem [shape: f32[8,1], index: 3, kind: input, shape index: {}]   ;;  %s948_s7 = inlined_call_operand.vmem [shape: f32[9,128], index: 7, kind: input, shape index: {}]   ;;  %s949_s8 = inlined_call_operand.vmem [shape: f32[128,128], index: 8, kind: input, shape index: {}]   ;;  %s950_s4 = inlined_call_operand.vmem [shape: f32[8,72], index: 4, kind: input, shape index: {}]   ;;  %s951_s9 = inlined_call_operand.vmem [shape: f32[8,128], index: 9, kind: input, shape index: {}]   ;;  %s952_s5 = inlined_call_operand.vmem [shape: f32[8,1], index: 5, kind: input, shape index: {}]   ;;  %s953_s6 = inlined_call_operand.vmem [shape: f32[8,1], index: 6, kind: input, shape index: {}]   ;;  %s954_s10 = inlined_call_operand.vmem [shape: f32[8,1], index: 10, kind: input, shape index: {}]   ;;  %s955_s11 = inlined_call_operand.vmem [shape: f32[8,1], index: 11, kind: input, shape index: {}]   ;;  %s956_s12 = inlined_call_operand.vmem [shape: f32[8,128], index: 12, kind: output, shape index: {}]  }
   0x1   :  { %607 = vmatprep.subr.bf16.mxu0 %v687_v0  ;;  %v42_v1 = vld [vmem:[%s944_s0] sm:$0xff]  ;;  %v43_v2 = vld [vmem:[%s944_s0 + $0x8] sm:$0xff]  ;;  %v44_v3 = vld [vmem:[%s944_s0 + $0x10] sm:$0xff]  ;;  %548 = vmatprep.mubr.msk.f32.mxu0 %vm688_vm0, %v689_v4  ;;  %s694_s23 = smov 119   ;;  %s695_s24 = smov 1   ;;  %vm237_vm1 = vcmask 588800  }
   0x2   :  { %v608_v5 = vpack.c.bf16 %v43_v2, %v42_v1  ;;  %v45_v6 = vld [vmem:[%s944_s0 + $0x18] sm:$0xff]  ;;  %631 = vmatprep.subr.bf16.mxu1 %v687_v0  ;;  %569 = vmatprep.mubr.msk.f32.mxu1 %vm688_vm0, %v689_v4  ;;  %v46_v8 = vld [vmem:[%s944_s0 + $0x20] sm:$0xff]  ;;  %v47_v9 = vld [vmem:[%s944_s0 + $0x28] sm:$0xff]  ;;  %s697_s25 = smov 121   ;;  %s698_s26 = smov 120  }
   0x3   :  { %v611_v7 = vpack.c.bf16 %v45_v6, %v44_v3  ;;  %v614_v10 = vpack.c.bf16 %v47_v9, %v46_v8  ;;  %v48_v11 = vld [vmem:[%s944_s0 + $0x30] sm:$0xff]  ;;  %v49_v12 = vld [vmem:[%s944_s0 + $0x38] sm:$0xff]  ;;  %v50_v14 = vld [vmem:[%s944_s0 + $0x40] sm:$0xff]  ;;  %679 = vset.pattern.permute.xlu1 %v690_v30  ;;  %680 = vset.pattern.permute.xlu0 %v690_v30 }
   0x4   :  { %609 = vmatpush3.bf16.msra.mxu0 %v608_v5  ;;  %v617_v13 = vpack.c.bf16 %v49_v12, %v48_v11  ;;  %v51_v15 = vld [vmem:[%s944_s0 + $0x48] sm:$0xff]  ;;  %v52_v17 = vld [vmem:[%s944_s0 + $0x50] sm:$0xff]  ;;  %v53_v18 = vld [vmem:[%s944_s0 + $0x58] sm:$0xff] }
   0x5   :  { %610 = vmatprep.subr.bf16.mxu0 %v687_v0  ;;  %v620_v16 = vpack.c.bf16 %v51_v15, %v50_v14  ;;  %v623_v19 = vpack.c.bf16 %v53_v18, %v52_v17  ;;  %v54_v20 = vld [vmem:[%s944_s0 + $0x60] sm:$0xff]  ;;  %v55_v21 = vld [vmem:[%s944_s0 + $0x68] sm:$0xff]  ;;  %v56_v23 = vld [vmem:[%s944_s0 + $0x70] sm:$0xff] }
   0x6   :  { %v626_v22 = vpack.c.bf16 %v55_v21, %v54_v20  ;;  %v57_v24 = vld [vmem:[%s944_s0 + $0x78] sm:$0xff]  ;;  %v41_v26 = vld [vmem:[%s945_s1] sm:$0xff]  ;;  %v470_v14 = vld [vmem:[%s948_s7 + $0x8] ss:$0 sm:$0xff] }
   0x7   :  { %v629_v25 = vpack.c.bf16 %v57_v24, %v56_v23  ;;  %v128_v38 = vld [vmem:[%s946_s2] sm:$0xff]  ;;  %s693_s2 = smov 7   ;;  %v342_v17 = vld [vmem:[%s949_s8 + $0x8] sm:$0xff]  ;;  %v343_v21 = vld [vmem:[%s949_s8 + $0x10] sm:$0xff] }
   0x8   :  { %612 = vmatpush3.bf16.msra.mxu0 %v611_v7  ;;  %v129_v41 = vld [vmem:[%s947_s3] sm:$0xff]  ;;  %s696_s3 = smov 127   ;;  %v350_v30 = vld [vmem:[%s949_s8 + $0x48] sm:$0xff] }
   0x9   :  { %613 = vmatprep.subr.bf16.mxu0 %v687_v0  ;;  %v463_v49 = vld [vmem:[%s948_s7 + $0x1] ss:$0 sm:$0xff]  ;;  %v462_v50 = vld [vmem:[%s948_s7] ss:$0 sm:$0xff]  ;;  %v464_v57 = vld [vmem:[%s948_s7 + $0x2] ss:$0 sm:$0xff] }
   0xa   :  { %v465_v58 = vld [vmem:[%s948_s7 + $0x3] ss:$0 sm:$0xff]  ;;  %v466_v62 = vld [vmem:[%s948_s7 + $0x4] ss:$0 sm:$0xff]  ;;  %v467_v63 = vld [vmem:[%s948_s7 + $0x5] ss:$0 sm:$0xff] }
   0xb   :  { %v468_v8 = vld [vmem:[%s948_s7 + $0x6] ss:$0 sm:$0xff]  ;;  %v469_v9 = vld [vmem:[%s948_s7 + $0x7] ss:$0 sm:$0xff] }
   0xc   :  { %615 = vmatpush3.bf16.msra.mxu0 %v614_v10  ;;  %v345_v24 = vld [vmem:[%s949_s8 + $0x20] sm:$0xff] }
   0xd   :  { %616 = vmatprep.subr.bf16.mxu0 %v687_v0 }
  0x10   :  { %618 = vmatpush3.bf16.msra.mxu0 %v617_v13 }
  0x11   :  { %619 = vmatprep.subr.bf16.mxu0 %v687_v0 }
  0x14   :  { %621 = vmatpush3.bf16.msra.mxu0 %v620_v16  ;;  %v341_v16 = vld [vmem:[%s949_s8] sm:$0xff] }
  0x15   :  { %622 = vmatprep.subr.bf16.mxu0 %v687_v0  ;;  %v644_v20 = vpack.c.bf16 %v342_v17, %v341_v16 }
  0x18   :  { %624 = vmatpush3.bf16.msra.mxu0 %v623_v19  ;;  %v236_v19 = vld [vmem:[%s950_s4] sm:$0xff] }
  0x19   :  { %625 = vmatprep.subr.bf16.mxu0 %v687_v0 }
  0x1c   :  { %627 = vmatpush3.bf16.msra.mxu0 %v626_v22  ;;  %v344_v22 = vld [vmem:[%s949_s8 + $0x18] sm:$0xff] }
  0x1d   :  { %628 = vmatprep.subr.bf16.mxu0 %v687_v0  ;;  %v647_v23 = vpack.c.bf16 %v344_v22, %v343_v21 }
  0x20   :  { %630 = vmatpush3.bf16.msra.mxu0 %v629_v25  ;;  %v346_v25 = vld [vmem:[%s949_s8 + $0x28] sm:$0xff] }
  0x23   :  { %549 = vmatmul.mubr.f32.vlgmr.msra.gmra.mrb[0].mxu0 %v41_v26  ;;  %v650_v26 = vpack.c.bf16 %v346_v25, %v345_v24 }
  0xf6   :  { %v124_v27 = vpop.f32.mrb[0].mxu0 }
  0xf7   :  { %130 = vadd.xlane.f32.xlu0 %v124_v27  ;;  %v550_v28 = vpop.f32.mrb[1].mxu0  ;;  %v133_v29 = vmul.f32 %v124_v27, %v124_v27 }
  0xfb   :  { %134 = vadd.xlane.f32.xlu0 %v133_v29  ;;  %v349_v29 = vld [vmem:[%s949_s8 + $0x40] sm:$0xff] }
 0x184   :  { %v131_v31 = vpop.xlane.xlu0 %130 }
 0x185   :  { %v132_v32 = vmul.f32 0.0078125, %v131_v31  ;;  %v656_v31 = vpack.c.bf16 %v350_v30, %v349_v29 }
 0x187   :  { %v137_v34 = vmul.f32 %v132_v32, %v132_v32 }
 0x188   :  { %v135_v33 = vpop.xlane.xlu0 %134 }
 0x189   :  { %v136_v35 = vmul.f32 0.0078125, %v135_v33  ;;  %v352_v33 = vld [vmem:[%s949_s8 + $0x58] sm:$0xff] }
 0x18b   :  { %v138_v36 = vsub.f32 %v136_v35, %v137_v34  ;;  %v353_v35 = vld [vmem:[%s949_s8 + $0x60] sm:$0xff] }
 0x18d   :  { %v139_v37 = vadd.f32 1e-05, %v138_v36  ;;  %v354_v36 = vld [vmem:[%s949_s8 + $0x68] sm:$0xff] }
 0x18f   :  { %681 = vrsqrt.f32 %v139_v37  ;;  %v662_v37 = vpack.c.bf16 %v354_v36, %v353_v35 }
 0x199   :  { %v682_v39 = vpop.eup %681 }
 0x19a   :  { %v141_v40 = vmul.f32 %v682_v39, %v128_v38  ;;  %v355_v38 = vld [vmem:[%s949_s8 + $0x70] sm:$0xff]  ;;  %v356_v39 = vld [vmem:[%s949_s8 + $0x78] sm:$0xff] }
 0x19c   :  { %146 = vperm.xlu1 %679, %v141_v40   ;;  %v142_v42 = vmul.f32 %v141_v40, %v132_v32  ;;  %v351_v32 = vld [vmem:[%s949_s8 + $0x50] sm:$0xff]  ;;  %v665_v40 = vpack.c.bf16 %v356_v39, %v355_v38 }
 0x19d   :  { %v659_v34 = vpack.c.bf16 %v352_v33, %v351_v32 }
 0x19e   :  { %v143_v43 = vsub.f32 %v129_v41, %v142_v42  ;;  %v340_v41 = vld [vmem:[%s951_s9] sm:$0xff] }
 0x1a0   :  { %152 = vperm.xlu1 %679, %v143_v43  }
 0x21b   :  { %v147_v44 = vpop.permute.xlu1 %146 }
 0x21c   :  { %v149_v45 = vmul.f32 %v147_v44, %v124_v27  ;;  %v347_v27 = vld [vmem:[%s949_s8 + $0x30] sm:$0xff] }
 0x21f   :  { %v153_v46 = vpop.permute.xlu1 %152 }
 0x220   :  { %v155_v47 = vadd.f32 %v153_v46, %v149_v45 }
 0x222   :  { %v156_v48 = vmax.f32 %v155_v47, 0.0 }
 0x224   :  { %167 = vrot.lane.b32.xlu1 %v156_v48, %s691_s21  ;;  %158 = vrot.lane.b32.xlu0 %v156_v48, %s692_s22  ;;  %v199_v3 = vmul.f32 %v466_v62, %v156_v48 }
 0x228   :  { %176 = vrot.lane.b32.xlu1 %v156_v48, %s693_s2  ;;  %227 = vrot.lane.b32.xlu0 %v156_v48, %s694_s23 }
 0x22c   :  { %185 = vrot.lane.b32.xlu1 %v156_v48, %s695_s24 }
 0x230   :  { %200 = vrot.lane.b32.xlu1 %v156_v48, %s696_s3 }
 0x234   :  { %209 = vrot.lane.b32.xlu1 %v156_v48, %s697_s25 }
 0x238   :  { %218 = vrot.lane.b32.xlu1 %v156_v48, %s698_s26 }
 0x296   :  { %v168_v51 = vpop.permute.xlu1 %167  ;;  %v159_v52 = vpop.permute.xlu0 %158 }
 0x297   :  { %v175_v53 = vmul.f32 %v463_v49, %v168_v51  ;;  %v166_v54 = vmul.f32 %v462_v50, %v159_v52 }
 0x299   :  { %v632_v55 = vpack.c.bf16 %v175_v53, %v166_v54  ;;  %v311_v54 = vld [vmem:[%s952_s5] sm:$0xff] }
 0x29a   :  { %v177_v56 = vpop.permute.xlu1 %176  ;;  %v228_v15 = vpop.permute.xlu0 %227 }
 0x29b   :  { %633 = vmatpush3.bf16.msra.mxu1 %v632_v55  ;;  %v184_v60 = vmul.f32 %v464_v57, %v177_v56  ;;  %v235_v18 = vmul.f32 %v470_v14, %v228_v15  ;;  %v312_v57 = vld [vmem:[%s953_s6] sm:$0xff] }
 0x29c   :  { %634 = vmatprep.subr.bf16.mxu1 %v687_v0 }
 0x29e   :  { %v186_v59 = vpop.permute.xlu1 %185 }
 0x29f   :  { %v193_v61 = vmul.f32 %v465_v58, %v186_v59 }
 0x2a1   :  { %v635_v1 = vpack.c.bf16 %v193_v61, %v184_v60 }
 0x2a2   :  { %v201_v2 = vpop.permute.xlu1 %200 }
 0x2a3   :  { %v208_v5 = vmul.f32 %v467_v63, %v201_v2  ;;  %636 = vmatpush3.bf16.msra.mxu1 %v635_v1 }
 0x2a4   :  { %637 = vmatprep.subr.bf16.mxu1 %v687_v0 }
 0x2a5   :  { %v638_v6 = vpack.c.bf16 %v208_v5, %v199_v3  ;;  %v427_v5 = vld [vmem:[%s954_s10] sm:$0xff] }
 0x2a6   :  { %v210_v7 = vpop.permute.xlu1 %209 }
 0x2a7   :  { %639 = vmatpush3.bf16.msra.mxu1 %v638_v6  ;;  %v217_v11 = vmul.f32 %v468_v8, %v210_v7  ;;  %v428_v8 = vld [vmem:[%s955_s11] sm:$0xff] }
 0x2a8   :  { %640 = vmatprep.subr.bf16.mxu1 %v687_v0 }
 0x2aa   :  { %v219_v10 = vpop.permute.xlu1 %218 }
 0x2ab   :  { %v226_v12 = vmul.f32 %v469_v9, %v219_v10 }
 0x2ad   :  { %v641_v13 = vpack.c.bf16 %v226_v12, %v217_v11 }
 0x2af   :  { %642 = vmatpush3.bf16.msra.mxu1 %v641_v13 }
 0x2b0   :  { %567 = vmatprep.subr.mxu1 %v689_v4 }
 0x2b3   :  { %568 = vmatpush3.msra.mxu1 %v235_v18 }
 0x2b4   :  { %570 = vmatmul.mubr.msk.f32.vlgmr.msra.gmra.mrb[0].mxu1 %vm237_vm1, %v236_v19  ;;  %643 = vmatprep.subr.bf16.mxu1 %v687_v0 }
 0x2b5   :  { %645 = vmatpush3.bf16.msra.mxu1 %v644_v20  ;;  %604 = vmatprep.mubr.msk.f32.mxu1 %vm688_vm0, %v689_v4  ;;  %v348_v4 = vld [vmem:[%s949_s8 + $0x38] sm:$0xff] }
 0x2b6   :  { %646 = vmatprep.subr.bf16.mxu1 %v687_v0  ;;  %v653_v28 = vpack.c.bf16 %v348_v4, %v347_v27 }
 0x2b9   :  { %648 = vmatpush3.bf16.msra.mxu1 %v647_v23 }
 0x2ba   :  { %649 = vmatprep.subr.bf16.mxu1 %v687_v0 }
 0x2bd   :  { %651 = vmatpush3.bf16.msra.mxu1 %v650_v26 }
 0x2be   :  { %652 = vmatprep.subr.bf16.mxu1 %v687_v0 }
 0x2c1   :  { %654 = vmatpush3.bf16.msra.mxu1 %v653_v28 }
 0x2c2   :  { %655 = vmatprep.subr.bf16.mxu1 %v687_v0 }
 0x2c5   :  { %657 = vmatpush3.bf16.msra.mxu1 %v656_v31 }
 0x2c6   :  { %658 = vmatprep.subr.bf16.mxu1 %v687_v0 }
 0x2c9   :  { %660 = vmatpush3.bf16.msra.mxu1 %v659_v34 }
 0x2ca   :  { %661 = vmatprep.subr.bf16.mxu1 %v687_v0 }
 0x2cd   :  { %663 = vmatpush3.bf16.msra.mxu1 %v662_v37 }
 0x2ce   :  { %664 = vmatprep.subr.bf16.mxu1 %v687_v0 }
 0x2d1   :  { %666 = vmatpush3.bf16.msra.mxu1 %v665_v40 }
 0x2d4   :  { %605 = vmatmul.mubr.f32.vlgmr.msra.gmra.mrb[2].mxu1 %v340_v41 }
 0x387   :  { %v307_v42 = vpop.f32.mrb[0].mxu1 }
 0x388   :  { %313 = vadd.xlane.f32.xlu1 %v307_v42  ;;  %v571_v43 = vpop.f32.mrb[1].mxu1  ;;  %v316_v44 = vmul.f32 %v307_v42, %v307_v42 }
 0x38a   :  { %317 = vadd.xlane.f32.xlu0 %v316_v44 }
 0x3a7   :  { %v423_v45 = vpop.f32.mrb[2].mxu1 }
 0x3a8   :  { %429 = vadd.xlane.f32.xlu0 %v423_v45  ;;  %v606_v46 = vpop.f32.mrb[3].mxu1  ;;  %v432_v47 = vmul.f32 %v423_v45, %v423_v45 }
 0x3aa   :  { %433 = vadd.xlane.f32.xlu1 %v432_v47 }
 0x415   :  { %v314_v48 = vpop.xlane.xlu1 %313 }
 0x416   :  { %v315_v49 = vmul.f32 0.0078125, %v314_v48 }
 0x417   :  { %v318_v50 = vpop.xlane.xlu0 %317 }
 0x418   :  { %v320_v0 = vmul.f32 %v315_v49, %v315_v49  ;;  %v319_v51 = vmul.f32 0.0078125, %v318_v50 }
 0x41a   :  { %v321_v52 = vsub.f32 %v319_v51, %v320_v0 }
 0x41c   :  { %v322_v53 = vadd.f32 1e-05, %v321_v52 }
 0x41e   :  { %683 = vrsqrt.f32 %v322_v53 }
 0x428   :  { %v684_v55 = vpop.eup %683 }
 0x429   :  { %v324_v56 = vmul.f32 %v684_v55, %v311_v54 }
 0x42b   :  { %329 = vperm.xlu0 %680, %v324_v56   ;;  %v325_v58 = vmul.f32 %v324_v56, %v315_v49 }
 0x42d   :  { %v326_v59 = vsub.f32 %v312_v57, %v325_v58 }
 0x42f   :  { %335 = vperm.xlu1 %679, %v326_v59  }
 0x435   :  { %v430_v60 = vpop.xlane.xlu0 %429 }
 0x436   :  { %v431_v61 = vmul.f32 0.0078125, %v430_v60 }
 0x437   :  { %v434_v62 = vpop.xlane.xlu1 %433 }
 0x438   :  { %v436_v63 = vmul.f32 %v431_v61, %v431_v61  ;;  %v435_v1 = vmul.f32 0.0078125, %v434_v62 }
 0x43a   :  { %v437_v2 = vsub.f32 %v435_v1, %v436_v63 }
 0x43c   :  { %v438_v3 = vadd.f32 1e-05, %v437_v2 }
 0x43e   :  { %685 = vrsqrt.f32 %v438_v3 }
 0x448   :  { %v686_v6 = vpop.eup %685 }
 0x449   :  { %v440_v7 = vmul.f32 %v686_v6, %v427_v5 }
 0x44b   :  { %445 = vperm.xlu1 %679, %v440_v7   ;;  %v441_v9 = vmul.f32 %v440_v7, %v431_v61 }
 0x44d   :  { %v442_v10 = vsub.f32 %v428_v8, %v441_v9 }
 0x44f   :  { %451 = vperm.xlu1 %679, %v442_v10  }
 0x4aa   :  { %v330_v11 = vpop.permute.xlu0 %329 }
 0x4ab   :  { %v332_v13 = vmul.f32 %v330_v11, %v307_v42 }
 0x4ae   :  { %v336_v12 = vpop.permute.xlu1 %335 }
 0x4af   :  { %v338_v15 = vadd.f32 %v336_v12, %v332_v13 }
 0x4b1   :  { %v339_v18 = vmax.f32 %v338_v15, 0.0 }
 0x4ca   :  { %v446_v14 = vpop.permute.xlu1 %445 }
 0x4cb   :  { %v448_v16 = vmul.f32 %v446_v14, %v423_v45 }
 0x4ce   :  { %v452_v17 = vpop.permute.xlu1 %451 }
 0x4cf   :  { %v454_v19 = vadd.f32 %v452_v17, %v448_v16 }
 0x4d1   :  { %v455_v20 = vadd.f32 %v454_v19, %v339_v18 }
 0x4d3   :  { %v456_v21 = vmax.f32 %v455_v20, 0.0 }
 0x4d5   :  { %457 = vst [vmem:[%s956_s12] sm:$0xff] %v456_v21 }

</bundles_post_ra>
